<compile_context>
chip_gen: v6e
topology: v6e:2x2x1
jax: 0.10.0
libtpu: 0.0.40
codegen_flags: <defaults>
</compile_context>

<pallas_src>
import jax
import jax.numpy as jnp
from jax.experimental import pallas as pl
from jax.experimental.pallas import tpu as pltpu


def _identity_kernel(x_ref, o_ref):
    # One load, one lane-dense (unmasked) store per tile.
    o_ref[...] = x_ref[...]


def _pick_tile(extent, unit, max_tile):
    """Largest tile <= max_tile that divides `extent` and is a multiple of
    `unit`.  Falls back to the full extent (always legal for a BlockSpec)."""
    best = None
    t = unit
    while t <= min(extent, max_tile):
        if extent % t == 0:
            best = t
        t += unit
    return best if best is not None else extent


@jax.jit
def identity_pallas(x):
    n, c, h, w = x.shape
    m = n * c          # sublane axis: fold N into C so small C still packs well
    l = h * w          # lane axis: H*W flattened -> lane-dense loads/stores
    x2 = x.reshape(m, l)

    # Lane-dense tiling: last dim a multiple of 128 (up to 2048 words),
    # sublane dim a multiple of 8 (f32 packing).  Small arrays fall back to
    # full-extent blocks.
    col_tile = _pick_tile(l, 128, 2048)
    row_tile = _pick_tile(m, 8, 256)
    grid = (m // row_tile, l // col_tile)

    out2 = pl.pallas_call(
        _identity_kernel,
        out_shape=jax.ShapeDtypeStruct((m, l), x.dtype),
        grid_spec=pltpu.PrefetchScalarGridSpec(
            num_scalar_prefetch=0,
            grid=grid,
            in_specs=[pl.BlockSpec((row_tile, col_tile), lambda i, j: (i, j))],
            out_specs=pl.BlockSpec((row_tile, col_tile), lambda i, j: (i, j)),
        ),
        compiler_params=pltpu.CompilerParams(
            # Both grid axes are independent -> Mosaic may shard them across
            # the two TensorCores on v7x; harmless on single-TC v5e/v6e.
            dimension_semantics=("parallel", "parallel"),
            # 2x input + 2x output double buffers at these tile sizes are
            # far under v7x's 64 MiB per-TC VMEM; set an explicit cap anyway.
            vmem_limit_bytes=64 * 1024 * 1024,
        ),
    )(x2)
    return out2.reshape(n, c, h, w)


if __name__ == "__main__":
    key = jax.random.PRNGKey(0)
    # Shapes consistent with the module: batch=2, channels=4, spatial=16x16.
    x = jax.random.normal(key, (2, 4, 16, 16), dtype=jnp.float32)

    out = identity_pallas(x)
    out = jax.block_until_ready(out)

    assert out.shape == x.shape and out.dtype == x.dtype
    assert bool(jnp.allclose(out, x)), "Identity kernel mismatch"
    print("KERNEL_OK")
</pallas_src>

<mosaic_0001>
module attributes {stable_mosaic.version = 11 : i64} {
  func.func @_identity_kernel(%arg0: i32, %arg1: i32, %arg2: memref<8x256xf32, #tpu.memory_space<vmem>>, %arg3: memref<8x256xf32, #tpu.memory_space<vmem>>) attributes {dimension_semantics = [#tpu.dimension_semantics<parallel>, #tpu.dimension_semantics<parallel>], iteration_bounds = array<i64: 1, 1>, scalar_prefetch = 0 : i64, scratch_operands = 0 : i64, tpu.core_type = #tpu.core_type<tc>, window_params = [{transform_indices = @transform_0, window_bounds = array<i64: 8, 256>}, {transform_indices = @transform_1, window_bounds = array<i64: 8, 256>}]} {
    %c0 = arith.constant 0 : index
    %c0_0 = arith.constant 0 : index
    %0 = vector.load %arg2[%c0, %c0_0] : memref<8x256xf32, #tpu.memory_space<vmem>>, vector<8x256xf32>
    %c0_1 = arith.constant 0 : index
    %c0_2 = arith.constant 0 : index
    %1 = vector.load %arg3[%c0_1, %c0_2] : memref<8x256xf32, #tpu.memory_space<vmem>>, vector<8x256xf32>
    tpu.vector_store %arg3[%c0_1, %c0_2], %0 {strides = array<i32>} : memref<8x256xf32, #tpu.memory_space<vmem>>, vector<8x256xf32>,
    return
  }
  func.func @transform_0(%arg0: i32, %arg1: i32) -> (i32, i32) {
    %c0_i32 = arith.constant 0 : i32
    return %arg0, %arg1 : i32, i32
  }
  func.func @transform_1(%arg0: i32, %arg1: i32) -> (i32, i32) {
    %c0_i32 = arith.constant 0 : i32
    return %arg0, %arg1 : i32, i32
  }
}

</mosaic_0001>

<bundles_post_ra>
// kernel: identity_pallas.1
= control target key start
LH: loop header
LB: loop body
LE: loop exit
PB: predicated region body
PF: predicated region fallthrough
CT: control target
= control target key end

     0   :  { %s38_s0 = inlined_call_operand.vmem [shape: f32[8,256], index: 0, kind: input, shape index: {}]   ;;  %s39_s1 = inlined_call_operand.vmem [shape: f32[8,256], index: 1, kind: output, shape index: {}]  }
   0x1   :  { %v8_v0 = vld [vmem:[%s38_s0] sm:$0xff]  ;;  %v9_v1 = vld [vmem:[%s38_s0 + $0x8] sm:$0xff] }
   0x2   :  { %10 = vst [vmem:[%s39_s1] sm:$0xff] %v8_v0  ;;  %11 = vst [vmem:[%s39_s1 + $0x8] sm:$0xff] %v9_v1 }

</bundles_post_ra>
